<compile_context>
chip_gen: v6e
topology: v6e:2x2x1
jax: 0.10.0
libtpu: 0.0.40
codegen_flags: <defaults>
</compile_context>

<pallas_src>
import functools

import jax
import jax.numpy as jnp
from jax.experimental import pallas as pl
from jax.experimental.pallas import tpu as pltpu


_LANE = 128


def _round_up(x, m):
    return (x + m - 1) // m * m


def _pick_row_tile(n_rows):
    """Largest row tile (<= 2048) that still leaves >= 8 grid steps."""
    for t in (2048, 1024, 512, 256):
        if pl.cdiv(n_rows, t) >= 8:
            return t
    return 128


def _pprgo_mlp_kernel(x_ref, w1_ref, w2_ref, w3t_ref, ot_ref):
    """relu(relu(x @ w1) @ w2) @ w3 for one row tile; output stored transposed."""
    x = x_ref[...].astype(jnp.bfloat16)                              # (TM, F)   bf16

    h = jnp.dot(x, w1_ref[...], preferred_element_type=jnp.float32)  # (TM, H1p) f32
    h = jnp.maximum(h, 0.0)                                          # ReLU in f32

    h = jnp.dot(h.astype(jnp.bfloat16), w2_ref[...],
                preferred_element_type=jnp.float32)                  # (TM, H2p) f32
    h = jnp.maximum(h, 0.0)

    # Transpose the activation (XLU; separate issue slot from MXU/VPU) so the
    # narrow C<<128 projection is emitted with a lane-dense last dim
    # (row_tile, multiple of 128): unmasked full-lane stores, writeback stays
    # at C*4 bytes per row.
    h_t = h.T.astype(jnp.bfloat16)                                   # (H2p, TM) bf16
    out_t = jnp.dot(w3t_ref[...], h_t,
                    preferred_element_type=jnp.float32)              # (C, TM)   f32
    ot_ref[...] = out_t.astype(ot_ref.dtype)


@functools.partial(jax.jit, static_argnames=("row_tile",))
def pprgo_mlp(x, w1, w2, w3, *, row_tile=None):
    """Fused PPRGoMLP forward (eval mode).

    x : [N, F]
    w1: [F, H1], w2: [H1, H2], w3: [H2, C]   (bias-free linears, stored [in, out])
    returns [N, C] float32
    """
    n, f = x.shape
    h1 = w1.shape[1]
    h2 = w2.shape[1]
    c = w3.shape[1]

    if row_tile is None:
        row_tile = _pick_row_tile(n)

    # ---- wrapper-side weight prep (tiny: <50 KB total) ----
    h1p = _round_up(h1, _LANE)
    h2p = _round_up(h2, _LANE)

    w1p = jnp.zeros((f, h1p), jnp.bfloat16).at[:, :h1].set(w1.astype(jnp.bfloat16))
    w2p = jnp.zeros((h1p, h2p), jnp.bfloat16).at[:h1, :h2].set(w2.astype(jnp.bfloat16))
    # Final projection passed pre-transposed: (C, H2p).
    w3t = jnp.zeros((c, h2p), jnp.bfloat16).at[:, :h2].set(w3.T.astype(jnp.bfloat16))

    grid = (pl.cdiv(n, row_tile),)

    flops = 2 * n * (f * h1p + h1p * h2p + h2p * c)
    bytes_accessed = (x.size * x.dtype.itemsize
                      + w1p.size * 2 + w2p.size * 2 + w3t.size * 2
                      + n * c * 4)

    out_t = pl.pallas_call(
        _pprgo_mlp_kernel,
        out_shape=jax.ShapeDtypeStruct((c, n), jnp.float32),
        grid_spec=pltpu.PrefetchScalarGridSpec(
            num_scalar_prefetch=0,
            grid=grid,
            in_specs=[
                # row tile of X (ragged edge block handled by Pallas masking)
                pl.BlockSpec((row_tile, f), lambda i: (i, 0)),
                # full weight matrices, VMEM-resident across the grid
                pl.BlockSpec((f, h1p), lambda i: (0, 0)),
                pl.BlockSpec((h1p, h2p), lambda i: (0, 0)),
                pl.BlockSpec((c, h2p), lambda i: (0, 0)),
            ],
            # lane-dense transposed output block (C, row_tile)
            out_specs=pl.BlockSpec((c, row_tile), lambda i: (0, i)),
        ),
        compiler_params=pltpu.CompilerParams(
            dimension_semantics=("parallel",),
        ),
        cost_estimate=pl.CostEstimate(
            flops=flops, transcendentals=0, bytes_accessed=bytes_accessed),
    )(x, w1p, w2p, w3t)

    # Back to [N, C]; undo the transpose outside the kernel (tiny C x N array).
    return out_t.T


def _reference(x, w1, w2, w3, cast=jnp.float32):
    """Pure-JAX reference. With cast=bfloat16 it mirrors the kernel's precision."""
    cc = lambda a: a.astype(cast)
    h = jnp.maximum(jnp.dot(cc(x), cc(w1), preferred_element_type=jnp.float32), 0.0)
    h = jnp.maximum(jnp.dot(cc(h), cc(w2), preferred_element_type=jnp.float32), 0.0)
    return jnp.dot(cc(h), cc(w3), preferred_element_type=jnp.float32)


if __name__ == "__main__":
    # Module config: PPRGoMLP(n_features=32, n_classes=8, n_filters=[64, 64],
    #                         dropout=0.5, batch_norm=False), eval-mode forward.
    n_features, n_classes = 32, 8
    n_filters = [64, 64]
    n_rows = 1000  # deliberately NOT a multiple of the row tile (ragged edge)

    key = jax.random.PRNGKey(0)
    kx, k1, k2, k3 = jax.random.split(key, 4)

    x = jax.random.normal(kx, (n_rows, n_features), dtype=jnp.float32)
    # Deterministic synthetic weights, stored as [in_dim, out_dim].
    w1 = jax.random.normal(k1, (n_features, n_filters[0]), dtype=jnp.float32) * 0.1
    w2 = jax.random.normal(k2, (n_filters[0], n_filters[1]), dtype=jnp.float32) * 0.1
    w3 = jax.random.normal(k3, (n_filters[1], n_classes), dtype=jnp.float32) * 0.1

    out = jax.block_until_ready(pprgo_mlp(x, w1, w2, w3))
    assert out.shape == (n_rows, n_classes)

    # Apples-to-apples check against a reference with the same bf16 casts.
    ref_bf16 = _reference(x, w1, w2, w3, cast=jnp.bfloat16)
    assert jnp.allclose(out, ref_bf16, atol=5e-3, rtol=5e-3), "mismatch vs bf16 reference"

    # Coarse sanity check against the pure-f32 module math.
    ref_f32 = _reference(x, w1, w2, w3, cast=jnp.float32)
    assert jnp.allclose(out, ref_f32, atol=6e-2, rtol=6e-2), "mismatch vs f32 reference"

    print("KERNEL_OK")
</pallas_src>

<mosaic_0001>
module attributes {stable_mosaic.version = 11 : i64} {
  func.func @_pprgo_mlp_kernel(%arg0: i32, %arg1: memref<128x32xf32, #tpu.memory_space<vmem>>, %arg2: memref<32x128xbf16, #tpu.memory_space<vmem>>, %arg3: memref<128x128xbf16, #tpu.memory_space<vmem>>, %arg4: memref<8x128xbf16, #tpu.memory_space<vmem>>, %arg5: memref<8x128xf32, #tpu.memory_space<vmem>>) attributes {dimension_semantics = [#tpu.dimension_semantics<parallel>], iteration_bounds = array<i64: 8>, scalar_prefetch = 0 : i64, scratch_operands = 0 : i64, tpu.core_type = #tpu.core_type<tc>, window_params = [{transform_indices = @transform_0, window_bounds = array<i64: 128, 32>}, {pipeline_mode = #tpu.pipeline_mode<synchronous>, transform_indices = @transform_1, window_bounds = array<i64: 32, 128>}, {pipeline_mode = #tpu.pipeline_mode<synchronous>, transform_indices = @transform_2, window_bounds = array<i64: 128, 128>}, {pipeline_mode = #tpu.pipeline_mode<synchronous>, transform_indices = @transform_3, window_bounds = array<i64: 8, 128>}, {transform_indices = @transform_4, window_bounds = array<i64: 8, 128>}]} {
    %c0 = arith.constant 0 : index
    %c0_0 = arith.constant 0 : index
    %0 = vector.load %arg1[%c0, %c0_0] : memref<128x32xf32, #tpu.memory_space<vmem>>, vector<128x32xf32>
    %1 = arith.truncf %0 : vector<128x32xf32> to vector<128x32xbf16>
    %c0_1 = arith.constant 0 : index
    %c0_2 = arith.constant 0 : index
    %2 = vector.load %arg2[%c0_1, %c0_2] : memref<32x128xbf16, #tpu.memory_space<vmem>>, vector<32x128xbf16>
    %cst = arith.constant dense<0.000000e+00> : vector<128x128xf32>
    %3 = tpu.matmul %1, %2, %cst {dimension_numbers = #tpu.dot_dimension_numbers<[1], [0], [0], [1], [0, 0, 1, 1], [], []>} : vector<128x32xbf16>, vector<32x128xbf16>, vector<128x128xf32> -> vector<128x128xf32>
    %cst_3 = arith.constant 0.000000e+00 : f32
    %4 = vector.broadcast %cst_3 : f32 to vector<128x128xf32>
    %5 = arith.maximumf %3, %4 : vector<128x128xf32>
    %6 = arith.truncf %5 : vector<128x128xf32> to vector<128x128xbf16>
    %c0_4 = arith.constant 0 : index
    %c0_5 = arith.constant 0 : index
    %7 = vector.load %arg3[%c0_4, %c0_5] : memref<128x128xbf16, #tpu.memory_space<vmem>>, vector<128x128xbf16>
    %cst_6 = arith.constant dense<0.000000e+00> : vector<128x128xf32>
    %8 = tpu.matmul %6, %7, %cst_6 {dimension_numbers = #tpu.dot_dimension_numbers<[1], [0], [0], [1], [0, 0, 1, 1], [], []>} : vector<128x128xbf16>, vector<128x128xbf16>, vector<128x128xf32> -> vector<128x128xf32>
    %cst_7 = arith.constant 0.000000e+00 : f32
    %9 = vector.broadcast %cst_7 : f32 to vector<128x128xf32>
    %10 = arith.maximumf %8, %9 : vector<128x128xf32>
    %11 = tpu.transpose %10, [1, 0] : vector<128x128xf32> -> vector<128x128xf32>
    %12 = arith.truncf %11 : vector<128x128xf32> to vector<128x128xbf16>
    %c0_8 = arith.constant 0 : index
    %c0_9 = arith.constant 0 : index
    %13 = vector.load %arg4[%c0_8, %c0_9] : memref<8x128xbf16, #tpu.memory_space<vmem>>, vector<8x128xbf16>
    %cst_10 = arith.constant dense<0.000000e+00> : vector<8x128xf32>
    %14 = tpu.matmul %13, %12, %cst_10 {dimension_numbers = #tpu.dot_dimension_numbers<[1], [0], [0], [1], [0, 0, 1, 1], [], []>} : vector<8x128xbf16>, vector<128x128xbf16>, vector<8x128xf32> -> vector<8x128xf32>
    %c0_11 = arith.constant 0 : index
    %c0_12 = arith.constant 0 : index
    %15 = vector.load %arg5[%c0_11, %c0_12] : memref<8x128xf32, #tpu.memory_space<vmem>>, vector<8x128xf32>
    tpu.vector_store %arg5[%c0_11, %c0_12], %14 {strides = array<i32>} : memref<8x128xf32, #tpu.memory_space<vmem>>, vector<8x128xf32>,
    return
  }
  func.func @transform_0(%arg0: i32) -> (i32, i32) {
    %c0_i32 = arith.constant 0 : i32
    %c0_i32_0 = arith.constant 0 : i32
    return %arg0, %c0_i32 : i32, i32
  }
  func.func @transform_1(%arg0: i32) -> (i32, i32) {
    %c0_i32 = arith.constant 0 : i32
    %c0_i32_0 = arith.constant 0 : i32
    %c0_i32_1 = arith.constant 0 : i32
    return %c0_i32, %c0_i32_0 : i32, i32
  }
  func.func @transform_2(%arg0: i32) -> (i32, i32) {
    %c0_i32 = arith.constant 0 : i32
    %c0_i32_0 = arith.constant 0 : i32
    %c0_i32_1 = arith.constant 0 : i32
    return %c0_i32, %c0_i32_0 : i32, i32
  }
  func.func @transform_3(%arg0: i32) -> (i32, i32) {
    %c0_i32 = arith.constant 0 : i32
    %c0_i32_0 = arith.constant 0 : i32
    %c0_i32_1 = arith.constant 0 : i32
    return %c0_i32, %c0_i32_0 : i32, i32
  }
  func.func @transform_4(%arg0: i32) -> (i32, i32) {
    %c0_i32 = arith.constant 0 : i32
    %c0_i32_0 = arith.constant 0 : i32
    return %c0_i32, %arg0 : i32, i32
  }
}

</mosaic_0001>

<bundles_post_ra>
// kernel: pprgo_mlp.1
= control target key start
LH: loop header
LB: loop body
LE: loop exit
PB: predicated region body
PF: predicated region fallthrough
CT: control target
= control target key end

     0   :  { %9 = vsyncpa [#allocation3], 0  ;;  %s1171_s0 = inlined_call_operand.vmem [shape: f32[1000,32], index: 0, kind: input, shape index: {}]   ;;  %s1172_s1 = inlined_call_operand.vmem [shape: bf16[32,128], index: 1, kind: input, shape index: {}]   ;;  %s1173_s2 = inlined_call_operand.vmem [shape: bf16[128,128], index: 2, kind: input, shape index: {}]   ;;  %s1174_s3 = inlined_call_operand.vmem [shape: bf16[8,128], index: 3, kind: input, shape index: {}]   ;;  %s1175_s4 = inlined_call_operand.hbm [shape: f32[8,1000], index: 4, kind: output, shape index: {}]  }
   0x1   :  { %11 = vsyncpa [#allocation3 + $0x1], 0  ;;  %s1014_s15 = smov 0   ;;  %s1016_s16 = smov 0  }
   0x2   :  { %s1018_s17 = smov 0   ;;  %s1020_s18 = smov 0  }
   0x3 LB: > { %s1035_s19 = sadd.s32 4294967295, %s984_s18   ;;  %s737_s20 = sadd.s32 4294967294, %s984_s18   ;;  %s984_s18 = sphi %s1020_s18, %s1181_s18   ;;  %s980_s17 = sphi %s1018_s17, %s1180_s17   ;;  %s976_s16 = sphi %s1016_s16, %s1179_s16   ;;  %s972_s15 = sphi %s1014_s15, %s1178_s15  }
   0x4   : > { %s1039_s21 = sadd.s32 1, %s984_s18   ;;  %s113_s22 = sadd.s32 1, %s980_s17 }
   0x5   : > { %s110_s23 = ssub.s32 %s984_s18, %s1039_s21  ;;  %p123_p0 = scmp.ne.s32.totalorder %s980_s17, %s976_s16 }
   0x6   : > { %p111_p1 = scmp.eq.s32.totalorder %s110_s23, 0  ;;  %p124_p2 = scmp.eq.s32.totalorder %s1035_s19, 7 }
   0x7   : > { %p129_p3 = scmp.ne.s32.totalorder %s976_s16, %s972_s15  ;;  %p130_p4 = scmp.eq.s32.totalorder %s737_s20, 7 }
   0x8   : > { %s1050_s24 = scalar_select %p111_p1, %s980_s17, %s113_s22  }
   0x9   : > { %p1052_p5 = por %p124_p2, %p123_p0  ;;  %p1056_p6 = por %p130_p4, %p129_p3 }
   0xa   : > { %p740_p7 = scmp.ge.s32.totalorder %s984_s18, 1  ;;  %p174_p8 = scmp.lt.s32.totalorder %s984_s18, 9 }
   0xc   : > { %p175_p9 = pnand %p740_p7, %p174_p8 }
   0xd   : > { %s742_s29 = sshll.u32 (!%p175_p9), %s1035_s19, 4  ;;  %s201_s11 = sand.u32 (!%p175_p9), 1, %s976_s16  }
   0xe   : > { %178 = sbr.rel (%p175_p9) target bundleno = 856 (0x358), region = 36  ;;  %p209_p10 = scmp.lt.s32.totalorder (!%p175_p9), %s742_s29, 124 }
   0xf   : > { %s741_s12 = sshll.u32 (!%p175_p9), %s201_s11, 3  ;;  %s763_s20 = sshll.u32 (!%p175_p9), %s1035_s19, 7 }
  0x10   : > { %s1132_s27 = scalar_lea.hbm (!%p175_p9), %s1175_s4, %s763_s20  ;;  %s665_s28 = scalar_lea.sflag (!%p175_p9), [#allocation3], %s201_s11 }
  0x11   : > { %s988_s19 = smov (!%p175_p9), [#allocation2]  }
  0x12   : > { %s928_s30 = sshll.u32 (!%p175_p9), %s988_s19, 4  ;;  %s929_s30 = int_to_ptr.vmem [resolvable:$false] %s928_s30 }
  0x13   : > { %v914_v0 = vld [vmem:[%s1172_s1 + $0x8] sm:$0xff]   ;;  %v915_v1 = vld [vmem:[%s1172_s1] sm:$0xff]   ;;  %v916_v2 = vld [vmem:[%s1173_s2 + $0x38] sm:$0xff]   ;;  %s1183_s29 = smov (!%p209_p10, %s742_s29), 124  ;;  %vm259_vm0 = vcmask 261120   ;;  %vm987_vm1 = vmmov 0  }
  0x14   : > { %801 = vmatprep.subr.bf16.mxu0 %v914_v0  ;;  %v917_v3 = vld [vmem:[%s1173_s2 + $0x30] sm:$0xff]   ;;  %821 = vmatprep.subr.bf16.mxu1 %v916_v2  ;;  %s743_s10 = sshll.u32 %s1183_s29, 3  ;;  %v918_v4 = vld [vmem:[%s1173_s2 + $0x28] sm:$0xff]   ;;  %v919_v14 = vld [vmem:[%s1173_s2 + $0x20] sm:$0xff]   ;;  %s930_s5 = scalar_lea.vmem %s929_s30, 256 }
  0x15   : > { %802 = vmatpush3.bf16.msra.mxu0 %v914_v0  ;;  %822 = vmatpush3.bf16.msra.mxu1 %v916_v2  ;;  %s1078_s13 = scalar_lea.vmem %s1171_s0, %s743_s10  ;;  %v920_v19 = vld [vmem:[%s1173_s2 + $0x18] sm:$0xff]   ;;  %v921_v31 = vld [vmem:[%s1173_s2 + $0x10] sm:$0xff]   ;;  %v922_v32 = vld [vmem:[%s1173_s2 + $0x8] sm:$0xff]  }
  0x16   : > { %803 = vmatprep.subr.bf16.mxu0 %v915_v1  ;;  %823 = vmatprep.subr.bf16.mxu1 %v917_v3  ;;  %v219_v5 = vld [vmem:[%s1078_s13] sm:$0xff]  ;;  %v220_v6 = vld [vmem:[%s1078_s13 + $0x8] sm:$0xff]  ;;  %v221_v7 = vld [vmem:[%s1078_s13 + $0x10] sm:$0xff] }
  0x17   : > { %v235_v8 = vpack.c.bf16 %v220_v6, %v219_v5  ;;  %v222_v9 = vld [vmem:[%s1078_s13 + $0x18] sm:$0xff]  ;;  %v223_v10 = vld [vmem:[%s1078_s13 + $0x20] sm:$0xff]  ;;  %v224_v11 = vld [vmem:[%s1078_s13 + $0x28] sm:$0xff] }
  0x18   : > { %v236_v12 = vpack.c.bf16 %v222_v9, %v221_v7  ;;  %v237_v13 = vpack.c.bf16 %v224_v11, %v223_v10  ;;  %v225_v15 = vld [vmem:[%s1078_s13 + $0x30] sm:$0xff]  ;;  %v226_v16 = vld [vmem:[%s1078_s13 + $0x38] sm:$0xff]  ;;  %v227_v17 = vld [vmem:[%s1078_s13 + $0x40] sm:$0xff] }
  0x19   : > { %804 = vmatpush3.bf16.msra.mxu0 %v915_v1  ;;  %824 = vmatpush3.bf16.msra.mxu1 %v917_v3  ;;  %v228_v18 = vld [vmem:[%s1078_s13 + $0x48] sm:$0xff]  ;;  %v238_v20 = vpack.c.bf16 %v226_v16, %v225_v15  ;;  %v229_v22 = vld [vmem:[%s1078_s13 + $0x50] sm:$0xff]  ;;  %v230_v23 = vld [vmem:[%s1078_s13 + $0x58] sm:$0xff] }
  0x1a   : > { %805 = vmatprep.mubr.msk.bf16.mxu0 %vm259_vm0, %v235_v8  ;;  %825 = vmatprep.subr.bf16.mxu1 %v918_v4  ;;  %v239_v21 = vpack.c.bf16 %v228_v18, %v227_v17  ;;  %v231_v24 = vld [vmem:[%s1078_s13 + $0x60] sm:$0xff]  ;;  %v232_v25 = vld [vmem:[%s1078_s13 + $0x68] sm:$0xff]  ;;  %v240_v26 = vpack.c.bf16 %v230_v23, %v229_v22  ;;  %v233_v28 = vld [vmem:[%s1078_s13 + $0x70] sm:$0xff] }
  0x1b   : > { %v241_v27 = vpack.c.bf16 %v232_v25, %v231_v24  ;;  %v234_v29 = vld [vmem:[%s1078_s13 + $0x78] sm:$0xff]  ;;  %v923_v33 = vld [vmem:[%s1173_s2] sm:$0xff]   ;;  %s203_s13 = scalar_lea.vmem [#allocation2], %s741_s12 }
  0x1c   : > { %806 = vmatmul.mubr.msk.bf16.vlgmr.msra.gmra.mxu0 %vm259_vm0, %v236_v12  ;;  %v242_v30 = vpack.c.bf16 %v234_v29, %v233_v28  ;;  %s678_s14 = sshll.u32 %s203_s13, 4  ;;  %s1127_s14 = int_to_ptr.vmem [resolvable:$true] %s678_s14 }
  0x1d   : > { %809 = vmatprep.mubr.msk.bf16.mxu0 %vm259_vm0, %v237_v13  ;;  %826 = vmatpush3.bf16.msra.mxu1 %v918_v4  ;;  %s924_s29 = scalar_lea.vmem %s1127_s14, 128  ;;  %p931_p0 = scmp.lt.s32.totalorder %s1127_s14, %s929_s30 }
  0x1e   : > { %827 = vmatprep.subr.bf16.mxu1 %v919_v14  ;;  %p925_p11 = scmp.ne.s32.totalorder %s1127_s14, %s924_s29  ;;  %p932_p1 = scmp.lt.s32.totalorder %s930_s5, %s924_s29 }
  0x20   : > { %p926_p12 = pnand %p925_p11, %p1052_p5  ;;  %p933_p2 = por %p932_p1, %p931_p0 }
  0x21   : > { %828 = vmatpush3.bf16.msra.mxu1 %v919_v14 }
  0x22   : > { %829 = vmatprep.subr.bf16.mxu1 %v920_v19  ;;  %p927_p13 = pneg %p926_p12 }
  0x24   : > { %810 = vmatmul.mubr.msk.bf16.gmra.mxu0 %vm259_vm0, %v238_v20  ;;  %p934_p3 = pnand %p933_p2, %p927_p13 }
  0x25   : > { %813 = vmatprep.mubr.msk.bf16.mxu0 %vm259_vm0, %v239_v21  ;;  %830 = vmatpush3.bf16.msra.mxu1 %v920_v19 }
  0x26   : > { %831 = vmatprep.subr.bf16.mxu1 %v921_v31 }
  0x29   : > { %832 = vmatpush3.bf16.msra.mxu1 %v921_v31 }
  0x2a   : > { %833 = vmatprep.subr.bf16.mxu1 %v922_v32 }
  0x2c   : > { %814 = vmatmul.mubr.msk.bf16.gmra.mxu0 %vm259_vm0, %v240_v26 }
  0x2d   : > { %817 = vmatprep.mubr.msk.bf16.mxu0 %vm259_vm0, %v241_v27  ;;  %834 = vmatpush3.bf16.msra.mxu1 %v922_v32 }
  0x2e   : > { %835 = vmatprep.subr.bf16.mxu1 %v923_v33 }
  0x31   : > { %836 = vmatpush3.bf16.msra.mxu1 %v923_v33 }
  0x34   : > { %818 = vmatmul.mubr.msk.bf16.gmra.mxu0 %vm259_vm0, %v242_v30 }
  0xdc   : > { %v807_v34 = vpop.f32.mrf.mxu0 }
  0xdd   : > { %v383_v41 = vmax.f32 %v807_v34, 0.0 }
  0xde   : > { %v318_v35 = vpop.f32.mrf.mxu0 }
  0xdf   : > { %v381_v39 = vmax.f32 %v318_v35, 0.0 }
  0xe0   : > { %v808_v36 = vpop.f32.mrf.mxu0 }
  0xe1   : > { %v384_v37 = vmax.f32 %v808_v36, 0.0 }
  0xe2   : > { %v321_v38 = vpop.f32.mrf.mxu0 }
  0xe3   : > { %v382_v40 = vmax.f32 %v321_v38, 0.0  ;;  %v398_v44 = vpack.c.bf16 %v384_v37, %v383_v41 }
  0xe4   : > { %v811_v42 = vpop.f32.mrf.mxu0 }
  0xe5   : > { %v397_v43 = vpack.c.bf16 %v382_v40, %v381_v39  ;;  %v387_v46 = vmax.f32 %v811_v42, 0.0  ;;  %v986_v42 = vmov 0.0  }
  0xe6   : > { %v334_v45 = vpop.f32.mrf.mxu0  ;;  %853 = vmatprep.subr.bf16.mxu0 %v986_v42  ;;  %869 = vmatprep.mubr.msk.bf16.mxu0 %vm987_vm1, %v986_v42 }
  0xe7   : > { %837 = vmatprep.mubr.bf16.mxu1 %v397_v43  ;;  %v385_v48 = vmax.f32 %v334_v45, 0.0 }
  0xe8   : > { %v812_v47 = vpop.f32.mrf.mxu0  ;;  %838 = vmatmul.mubr.bf16.vlgmr.msra.gmra.mxu1 %v398_v44 }
  0xe9   : > { %v388_v49 = vmax.f32 %v812_v47, 0.0 }
  0xea   : > { %v337_v50 = vpop.f32.mrf.mxu0 }
  0xeb   : > { %v386_v51 = vmax.f32 %v337_v50, 0.0  ;;  %v400_v52 = vpack.c.bf16 %v388_v49, %v387_v46 }
  0xec   : > { %v815_v53 = vpop.f32.mrf.mxu0 }
  0xed   : > { %v399_v54 = vpack.c.bf16 %v386_v51, %v385_v48  ;;  %v391_v56 = vmax.f32 %v815_v53, 0.0 }
  0xee   : > { %v350_v55 = vpop.f32.mrf.mxu0 }
  0xef   : > { %841 = vmatprep.mubr.bf16.mxu1 %v399_v54  ;;  %v389_v58 = vmax.f32 %v350_v55, 0.0 }
  0xf0   : > { %842 = vmatmul.mubr.bf16.gmra.mxu1 %v400_v52  ;;  %v816_v57 = vpop.f32.mrf.mxu0 }
  0xf1   : > { %v392_v59 = vmax.f32 %v816_v57, 0.0 }
  0xf2   : > { %v353_v60 = vpop.f32.mrf.mxu0 }
  0xf3   : > { %v390_v61 = vmax.f32 %v353_v60, 0.0  ;;  %v402_v62 = vpack.c.bf16 %v392_v59, %v391_v56 }
  0xf4   : > { %v819_v63 = vpop.f32.mrf.mxu0 }
  0xf5   : > { %v401_v0 = vpack.c.bf16 %v390_v61, %v389_v58  ;;  %v395_v2 = vmax.f32 %v819_v63, 0.0 }
  0xf6   : > { %v366_v1 = vpop.f32.mrf.mxu0 }
  0xf7   : > { %845 = vmatprep.mubr.bf16.mxu1 %v401_v0  ;;  %v393_v4 = vmax.f32 %v366_v1, 0.0 }
  0xf8   : > { %846 = vmatmul.mubr.bf16.gmra.mxu1 %v402_v62  ;;  %v820_v3 = vpop.f32.mrf.mxu0 }
  0xf9   : > { %v396_v5 = vmax.f32 %v820_v3, 0.0  ;;  %v622_v3 = vld [vmem:[%s1174_s3] sm:$0xf] }
  0xfa   : > { %v369_v6 = vpop.f32.mrf.mxu0 }
  0xfb   : > { %v394_v7 = vmax.f32 %v369_v6, 0.0  ;;  %v404_v8 = vpack.c.bf16 %v396_v5, %v395_v2 }
  0xfd   : > { %v403_v9 = vpack.c.bf16 %v394_v7, %v393_v4 }
  0xff   : > { %849 = vmatprep.mubr.bf16.mxu1 %v403_v9 }
 0x100   : > { %850 = vmatmul.mubr.bf16.gmra.mxu1 %v404_v8 }
 0x1a8   : > { %v839_v10 = vpop.f32.mrf.mxu1 }
 0x1a9   : > { %v568_v17 = vmax.f32 %v839_v10, 0.0 }
 0x1aa   : > { %v503_v11 = vpop.f32.mrf.mxu1 }
 0x1ab   : > { %v566_v12 = vmax.f32 %v503_v11, 0.0 }
 0x1ac   : > { %v840_v13 = vpop.f32.mrf.mxu1 }
 0x1ad   : > { %582 = vxpose.xlu0.b32.start [1/16] %v566_v12, 128  ;;  %v569_v19 = vmax.f32 %v840_v13, 0.0 }
 0x1ae   : > { %v506_v14 = vpop.f32.mrf.mxu1 }
 0x1af   : > { %v567_v15 = vmax.f32 %v506_v14, 0.0 }
 0x1b0   : > { %v843_v16 = vpop.f32.mrf.mxu1 }
 0x1b1   : > { %583 = vxpose.xlu0.b32.cont [2/16] %v567_v15, 128  ;;  %v572_v25 = vmax.f32 %v843_v16, 0.0 }
 0x1b2   : > { %v519_v18 = vpop.f32.mrf.mxu1 }
 0x1b3   : > { %v570_v21 = vmax.f32 %v519_v18, 0.0 }
 0x1b4   : > { %v844_v20 = vpop.f32.mrf.mxu1 }
 0x1b5   : > { %584 = vxpose.xlu0.b32.cont [3/16] %v568_v17, 128  ;;  %v573_v27 = vmax.f32 %v844_v20, 0.0 }
 0x1b6   : > { %v522_v22 = vpop.f32.mrf.mxu1 }
 0x1b7   : > { %v571_v23 = vmax.f32 %v522_v22, 0.0 }
 0x1b8   : > { %v847_v24 = vpop.f32.mrf.mxu1 }
 0x1b9   : > { %585 = vxpose.xlu0.b32.cont [4/16] %v569_v19, 128  ;;  %v576_v33 = vmax.f32 %v847_v24, 0.0 }
 0x1ba   : > { %v535_v26 = vpop.f32.mrf.mxu1 }
 0x1bb   : > { %v574_v29 = vmax.f32 %v535_v26, 0.0 }
 0x1bc   : > { %v848_v28 = vpop.f32.mrf.mxu1 }
 0x1bd   : > { %586 = vxpose.xlu0.b32.cont [5/16] %v570_v21, 128  ;;  %v577_v35 = vmax.f32 %v848_v28, 0.0 }
 0x1be   : > { %v538_v30 = vpop.f32.mrf.mxu1 }
 0x1bf   : > { %v575_v31 = vmax.f32 %v538_v30, 0.0 }
 0x1c0   : > { %v851_v32 = vpop.f32.mrf.mxu1 }
 0x1c1   : > { %587 = vxpose.xlu0.b32.cont [6/16] %v571_v23, 128  ;;  %v580_v40 = vmax.f32 %v851_v32, 0.0 }
 0x1c2   : > { %v551_v34 = vpop.f32.mrf.mxu1 }
 0x1c3   : > { %v578_v37 = vmax.f32 %v551_v34, 0.0 }
 0x1c4   : > { %v852_v36 = vpop.f32.mrf.mxu1 }
 0x1c5   : > { %588 = vxpose.xlu0.b32.cont [7/16] %v572_v25, 128  ;;  %v581_v41 = vmax.f32 %v852_v36, 0.0 }
 0x1c6   : > { %v554_v38 = vpop.f32.mrf.mxu1 }
 0x1c7   : > { %v579_v39 = vmax.f32 %v554_v38, 0.0 }
 0x1c9   : > { %589 = vxpose.xlu0.b32.cont [8/16] %v573_v27, 128 }
 0x1cd   : > { %590 = vxpose.xlu0.b32.cont [9/16] %v574_v29, 128 }
 0x1d1   : > { %591 = vxpose.xlu0.b32.cont [10/16] %v575_v31, 128 }
 0x1d5   : > { %592 = vxpose.xlu0.b32.cont [11/16] %v576_v33, 128 }
 0x1d9   : > { %593 = vxpose.xlu0.b32.cont [12/16] %v577_v35, 128 }
 0x1dd   : > { %594 = vxpose.xlu0.b32.cont [13/16] %v578_v37, 128 }
 0x1e1   : > { %595 = vxpose.xlu0.b32.cont [14/16] %v579_v39, 128 }
 0x1e5   : > { %596 = vxpose.xlu0.b32.cont [15/16] %v580_v40, 128 }
 0x1e9   : > { %597 = vxpose.xlu0.b32.end [16/16] %v581_v41, 128 }
 0x229   : > { %v598_v43 = vpop.trf.xlu0 }
 0x22d   : > { %v599_v44 = vpop.trf.xlu0 }
 0x22e   : > { %v614_v45 = vpack.c.bf16 %v599_v44, %v598_v43 }
 0x231   : > { %v600_v46 = vpop.trf.xlu0 }
 0x235   : > { %v601_v47 = vpop.trf.xlu0 }
 0x236   : > { %v615_v48 = vpack.c.bf16 %v601_v47, %v600_v46 }
 0x239   : > { %v602_v49 = vpop.trf.xlu0 }
 0x23d   : > { %v603_v50 = vpop.trf.xlu0 }
 0x23e   : > { %v616_v2 = vpack.c.bf16 %v603_v50, %v602_v49 }
 0x241   : > { %v604_v51 = vpop.trf.xlu0 }
 0x245   : > { %v605_v52 = vpop.trf.xlu0 }
 0x246   : > { %v617_v1 = vpack.c.bf16 %v605_v52, %v604_v51 }
 0x249   : > { %v606_v53 = vpop.trf.xlu0 }
 0x24d   : > { %v607_v54 = vpop.trf.xlu0 }
 0x24e   : > { %v618_v0 = vpack.c.bf16 %v607_v54, %v606_v53 }
 0x251   : > { %v608_v55 = vpop.trf.xlu0 }
 0x255   : > { %v609_v56 = vpop.trf.xlu0 }
 0x256   : > { %v619_v63 = vpack.c.bf16 %v609_v56, %v608_v55 }
 0x259   : > { %v610_v57 = vpop.trf.xlu0 }
 0x25d   : > { %v611_v58 = vpop.trf.xlu0 }
 0x25e   : > { %v620_v62 = vpack.c.bf16 %v611_v58, %v610_v57 }
 0x261   : > { %v612_v59 = vpop.trf.xlu0 }
 0x265   : > { %v613_v60 = vpop.trf.xlu0 }
 0x266   : > { %v621_v61 = vpack.c.bf16 %v613_v60, %v612_v59 }
 0x268   : > { %854 = vmatpush3.bf16.msra.mxu0 %v621_v61 }
 0x269   : > { %855 = vmatprep.subr.bf16.mxu0 %v986_v42 }
 0x26c   : > { %856 = vmatpush3.bf16.msra.mxu0 %v620_v62 }
 0x26d   : > { %857 = vmatprep.subr.bf16.mxu0 %v986_v42 }
 0x270   : > { %858 = vmatpush3.bf16.msra.mxu0 %v619_v63 }
 0x271   : > { %859 = vmatprep.subr.bf16.mxu0 %v986_v42 }
 0x274   : > { %860 = vmatpush3.bf16.msra.mxu0 %v618_v0 }
 0x275   : > { %861 = vmatprep.subr.bf16.mxu0 %v986_v42 }
 0x278   : > { %862 = vmatpush3.bf16.msra.mxu0 %v617_v1 }
 0x279   : > { %863 = vmatprep.subr.bf16.mxu0 %v986_v42 }
 0x27c   : > { %864 = vmatpush3.bf16.msra.mxu0 %v616_v2 }
 0x27d   : > { %865 = vmatprep.subr.bf16.mxu0 %v986_v42 }
 0x280   : > { %866 = vmatpush3.bf16.msra.mxu0 %v615_v48 }
 0x281   : > { %867 = vmatprep.subr.bf16.mxu0 %v986_v42 }
 0x284   : > { %868 = vmatpush3.bf16.msra.mxu0 %v614_v45 }
 0x287   : > { %870 = vmatmul.mubr.bf16.vlgmr.msra.gmra.mxu0 %v622_v3 }
 0x347   : > { %v657_v4 = vpop.f32.mrf.mxu0 }
 0x348   : > { %663 = vst [vmem:[%s203_s13] sm:$0xff] %v657_v4 }
 0x349   : > { %v871_v5 = vpop.f32.mrf.mxu0 }
 0x34a   : > { %937 = shalt.err (!%p934_p3)
}
 0x34b   : > { %s938_s6 = scalar_lea.hbm %s1132_s27, 128  ;;  %s942_s9 = scalar_lea.hbm %s1175_s4, 1024 }
 0x34c   : > { %p939_p4 = scmp.ne.s32.totalorder %s1132_s27, %s938_s6  ;;  %p943_p9 = scmp.lt.s32.totalorder %s1132_s27, %s1175_s4 }
 0x34d   : > { %p944_p10 = scmp.lt.s32.totalorder %s942_s9, %s938_s6 }
 0x34e   : > { %p940_p7 = pnand %p939_p4, %p1052_p5 }
 0x34f   : > { %p945_p11 = por %p944_p10, %p943_p9 }
 0x350   : > { %p941_p8 = pneg %p940_p7 }
 0x352   : > { %p946_p12 = pnand %p945_p11, %p941_p8 }
 0x354   : > { %949 = shalt.err (!%p946_p12)
}
 0x355   : > { %873 = dma.vmem_to_hbm [thread:$0]  (%p1052_p5), %s1127_s14, 128, %s1132_s27, %s665_s28   ;;  %v660_v6 = vpop.f32.mrf.mxu0 }
 0x357   : > { %v872_v7 = vpop.f32.mrf.mxu0 }
 0x358 PF: > { %p879_p13 = scmp.ge.s32.totalorder %s984_s18, 2  ;;  %s690_s12 = sand.u32 1, %s972_s15  }
 0x359   : > { %s691_s13 = scalar_lea.sflag [#allocation3], %s690_s12 }
 0x35a   : > { %p876_p0 = pnand %p879_p13, %p1056_p6 }
 0x35c   : > { %p877_p1 = pneg %p876_p0 }
 0x35e   : > { %967 = dma.done.wait (%p877_p1), %s691_s13, 128  }
 0x35f   : > { %969 = vsyncadd (%p877_p1), %s691_s13, 4294967168  ;;  %p14_p5 = scmp.ge.s32.totalorder %s1039_s21, 10   ;;  %s1178_s15 = smov %s976_s16 }
 0x360   : > { %s1179_s16 = smov %s980_s17  ;;  %s1180_s17 = smov %s1050_s24 }
 0x361   : > { %s1181_s18 = smov %s1039_s21  ;;  %16 = sbr.rel (!%p14_p5) target bundleno = 3 (0x3), region = 71 }
 0x366   :  { %696 = vsyncpa [#allocation3], 1 }
 0x367   :  { %698 = vsyncpa [#allocation3 + $0x1], 1 }

</bundles_post_ra>
